<compile_context>
chip_gen: v7x
topology: tpu7x:2x2x1
jax: 0.10.0
libtpu: 0.0.40
codegen_flags: <defaults>
</compile_context>

<pallas_src>
import functools

import jax
import jax.numpy as jnp
from jax.experimental import pallas as pl
from jax.experimental.pallas import tpu as pltpu


def _nll_block(logits_ref, tgt_ref):
    """Per-(b,t) negative log-likelihood for one (B, Tt, C) block."""
    logits = logits_ref[...].astype(jnp.float32)          # (B, Tt, C) f32 math
    tgt = tgt_ref[...]                                     # (B, Tt, 1) int32
    # Numerically stable log-sum-exp over classes.
    m = jnp.max(logits, axis=-1, keepdims=True)                               # (B,Tt,1)
    lse = m + jnp.log(jnp.sum(jnp.exp(logits - m), axis=-1, keepdims=True))   # (B,Tt,1)
    # Target-class logit via iota compare (no one-hot input, no f32 mask mul).
    eq = jax.lax.broadcasted_iota(jnp.int32, logits.shape, 2) == tgt          # (B,Tt,C) bool
    tgt_logit = jnp.sum(jnp.where(eq, logits, 0.0), axis=-1, keepdims=True)   # (B,Tt,1)
    return lse - tgt_logit, eq


def _valid_mask(tt, t_total, shape):
    """Mask for timesteps that only exist because of the edge block."""
    t0 = (pl.program_id(0) * pl.num_programs(1) + pl.program_id(1)) * tt
    t_idx = t0 + jax.lax.broadcasted_iota(jnp.int32, shape, 0)
    return t_idx < t_total


def _plain_ce_kernel(logits_ref, tgt_ref, out_ref, *, tt, t_total):
    @pl.when(pl.program_id(1) == 0)
    def _init():
        out_ref[...] = jnp.zeros_like(out_ref)

    nll, _ = _nll_block(logits_ref, tgt_ref)               # (B,Tt,1)
    sum_t = jnp.sum(nll, axis=0)                           # (Tt,1) sum over batch
    valid = _valid_mask(tt, t_total, sum_t.shape)
    out_ref[...] += jnp.sum(jnp.where(valid, sum_t, 0.0))  # wrapper divides by B*T


def _weighted_ce_kernel(logits_ref, tgt_ref, w_ref, out_ref, *, tt, t_total):
    @pl.when(pl.program_id(1) == 0)
    def _init():
        out_ref[...] = jnp.zeros_like(out_ref)

    nll, eq = _nll_block(logits_ref, tgt_ref)              # (B,Tt,1), (B,Tt,C)
    w = w_ref[...].astype(jnp.float32)                     # (1,1,C), whole weight vector
    wb = jnp.sum(jnp.where(eq, w, 0.0), axis=-1, keepdims=True)   # (B,Tt,1) = w[target]

    num_t = jnp.sum(wb * nll, axis=0)                      # (Tt,1)
    den_t = jnp.sum(wb, axis=0)                            # (Tt,1)
    # Matches PyTorch: 0/0 -> NaN if every sample weight in a timestep is zero.
    per_t = num_t / den_t
    valid = _valid_mask(tt, t_total, per_t.shape)
    out_ref[...] += jnp.sum(jnp.where(valid, per_t, 0.0))  # wrapper divides by T


def criterion_loss(logits, targets, class_weights=None, *,
                   target_block_bytes=8 << 20, num_cores=1,
                   vmem_limit_bytes=48 * 1024 * 1024):
    """Pallas equivalent of Criterion.forward.

    Args:
      logits:  (B, T, C) float array (any float dtype; streamed natively, math in f32).
      targets: (B, T) integer array of class ids in [0, C).
      class_weights: optional (C,) float array.
      num_cores: 1 for v5e/v6e; 2 on v7x to shard the time range across TensorCores.

    Returns:
      scalar float32 loss.
    """
    B, T, C = logits.shape
    targets = targets.astype(jnp.int32)

    # --- dtype-aware time-tile sizing ----------------------------------------
    itemsize = logits.dtype.itemsize
    if itemsize >= 4:
        mult = 8        # f32 sublane packing
    elif itemsize == 2:
        mult = 16       # bf16 / f16 packed sublanes
    else:
        mult = 32       # int8 / fp8

    row_bytes = B * C * itemsize               # logits bytes per timestep
    aux_row_bytes = B * 128 * 4                # targets block: last dim lane-padded to 128
    budget_rows = max(mult, target_block_bytes // (row_bytes + aux_row_bytes))
    tt = max(mult, (budget_rows // mult) * mult)

    if tt >= T:
        tt = T                                  # full-extent block (always legal)
        blocks_total = 1
    else:
        blocks_total = pl.cdiv(T, tt)           # last block may be a partial edge block

    # --- grid: (splits, blocks_per_split) ------------------------------------
    splits = min(max(1, num_cores), blocks_total)
    bps = pl.cdiv(blocks_total, splits)
    last_block = blocks_total - 1

    def block_idx(c, i):
        # Clamp dead tail blocks (only possible when splits > 1); the kernel masks
        # their contribution via t_idx < T, so re-reading the last block is exact.
        return (0, jnp.minimum(c * bps + i, last_block), 0)

    tgt3 = targets[:, :, None]                  # (B, T, 1)

    in_specs = [
        pl.BlockSpec((B, tt, C), block_idx),    # logits, native dtype
        pl.BlockSpec((B, tt, 1), block_idx),    # targets
    ]
    operands = [logits, tgt3]

    if class_weights is None:
        kernel = functools.partial(_plain_ce_kernel, tt=tt, t_total=T)
        scale = 1.0 / (B * T)
    else:
        w3 = jnp.asarray(class_weights, dtype=jnp.float32).reshape(1, 1, C)
        operands.append(w3)
        in_specs.append(pl.BlockSpec((1, 1, C), lambda c, i: (0, 0, 0)))
        kernel = functools.partial(_weighted_ce_kernel, tt=tt, t_total=T)
        scale = 1.0 / T

    core_sem = pltpu.CORE_PARALLEL if splits > 1 else "arbitrary"

    partials = pl.pallas_call(
        kernel,
        out_shape=jax.ShapeDtypeStruct((splits, 1, 1), jnp.float32),
        grid_spec=pltpu.PrefetchScalarGridSpec(
            num_scalar_prefetch=0,
            grid=(splits, bps),
            in_specs=in_specs,
            out_specs=pl.BlockSpec((1, 1, 1), lambda c, i: (c, 0, 0)),
        ),
        compiler_params=pltpu.CompilerParams(
            dimension_semantics=(core_sem, "arbitrary"),
            vmem_limit_bytes=vmem_limit_bytes,
        ),
    )(*operands)

    return jnp.sum(partials) * scale


if __name__ == "__main__":
    key = jax.random.PRNGKey(0)
    k1, k2, k3, k4 = jax.random.split(key, 4)

    # Pure-JAX reference with PyTorch semantics.
    def ref_loss(lg, tg, w=None):
        logp = jax.nn.log_softmax(lg.astype(jnp.float32), axis=-1)
        nll = -jnp.take_along_axis(logp, tg[..., None], axis=-1)[..., 0]   # (B, T)
        if w is None:
            return jnp.mean(nll)
        wb = jnp.asarray(w, jnp.float32)[tg]
        return jnp.mean(jnp.sum(wb * nll, axis=0) / jnp.sum(wb, axis=0))

    # --- case 1: f32, (batch=2, num_future_samples=8, num_classes=32) --------
    B, T, C = 2, 8, 32
    logits = jax.random.normal(k1, (B, T, C), dtype=jnp.float32)
    targets = jax.random.randint(k2, (B, T), 0, C, dtype=jnp.int32)
    class_weights = jnp.linspace(0.5, 1.5, C, dtype=jnp.float32)

    l_unw = criterion_loss(logits, targets, class_weights=None)
    l_w = criterion_loss(logits, targets, class_weights=class_weights)
    jax.block_until_ready(l_unw)
    jax.block_until_ready(l_w)
    ok = (jnp.allclose(l_unw, ref_loss(logits, targets), rtol=1e-5, atol=1e-5)
          and jnp.allclose(l_w, ref_loss(logits, targets, class_weights),
                           rtol=1e-5, atol=1e-5))

    # --- case 2: native bf16 streaming (no wrapper cast, f32 math in kernel) --
    logits_bf16 = jax.random.normal(k3, (B, T, C), dtype=jnp.bfloat16)
    l_bf16 = criterion_loss(logits_bf16, targets, class_weights=None)
    jax.block_until_ready(l_bf16)
    ok = ok and jnp.allclose(l_bf16, ref_loss(logits_bf16, targets),
                             rtol=1e-4, atol=1e-4)

    # --- case 3: T not a multiple of the tile -> partial edge block is masked -
    T2 = 20
    logits2 = jax.random.normal(k4, (B, T2, C), dtype=jnp.float32)
    targets2 = jax.random.randint(k2, (B, T2), 0, C, dtype=jnp.int32)
    l2 = criterion_loss(logits2, targets2, class_weights=class_weights,
                        target_block_bytes=1)   # force tt=8 -> 3 blocks, last partial
    jax.block_until_ready(l2)
    ok = ok and jnp.allclose(l2, ref_loss(logits2, targets2, class_weights),
                             rtol=1e-5, atol=1e-5)

    if not bool(ok):
        raise AssertionError("Pallas loss does not match reference")
    print("KERNEL_OK")
</pallas_src>

<mosaic_0001>
module attributes {stable_mosaic.version = 11 : i64} {
  func.func @_plain_ce_kernel(%arg0: i32, %arg1: i32, %arg2: memref<2x8x32xf32, #tpu.memory_space<vmem>>, %arg3: memref<2x8x1xi32, #tpu.memory_space<vmem>>, %arg4: memref<1x1x1xf32, #tpu.memory_space<vmem>>) attributes {dimension_semantics = [#tpu.dimension_semantics<arbitrary>, #tpu.dimension_semantics<arbitrary>], iteration_bounds = array<i64: 1, 1>, scalar_prefetch = 0 : i64, scratch_operands = 0 : i64, tpu.core_type = #tpu.core_type<tc>, window_params = [{transform_indices = @transform_0, window_bounds = array<i64: 2, 8, 32>}, {transform_indices = @transform_1, window_bounds = array<i64: 2, 8, 1>}, {transform_indices = @transform_2, window_bounds = array<i64: 1, 1, 1>}]} {
    %c0_i32 = arith.constant 0 : i32
    %0 = arith.cmpi eq, %arg1, %c0_i32 : i32
    %1 = arith.extui %0 : i1 to i32
    %c0_i32_0 = arith.constant 0 : i32
    %2 = arith.cmpi ne, %1, %c0_i32_0 : i32
    scf.if %2 {
      %cst_19 = arith.constant 0.000000e+00 : f32
      %41 = vector.broadcast %cst_19 : f32 to vector<1x1x1xf32>
      %c0_20 = arith.constant 0 : index
      %c0_21 = arith.constant 0 : index
      %c0_22 = arith.constant 0 : index
      %42 = vector.load %arg4[%c0_20, %c0_21, %c0_22] : memref<1x1x1xf32, #tpu.memory_space<vmem>>, vector<1x1x1xf32>
      tpu.vector_store %arg4[%c0_20, %c0_21, %c0_22], %41 {strides = array<i32>} : memref<1x1x1xf32, #tpu.memory_space<vmem>>, vector<1x1x1xf32>,
    } else {
    }
    %c0 = arith.constant 0 : index
    %c0_1 = arith.constant 0 : index
    %c0_2 = arith.constant 0 : index
    %3 = vector.load %arg2[%c0, %c0_1, %c0_2] : memref<2x8x32xf32, #tpu.memory_space<vmem>>, vector<2x8x32xf32>
    %c0_3 = arith.constant 0 : index
    %c0_4 = arith.constant 0 : index
    %c0_5 = arith.constant 0 : index
    %4 = vector.load %arg3[%c0_3, %c0_4, %c0_5] : memref<2x8x1xi32, #tpu.memory_space<vmem>>, vector<2x8x1xi32>
    %cst = arith.constant dense<0xFF800000> : vector<2x8xf32>
    %5 = vector.multi_reduction <maximumf>, %3, %cst [2] : vector<2x8x32xf32> to vector<2x8xf32>
    %6 = vector.shape_cast %5 : vector<2x8xf32> to vector<2x8x1xf32>
    %7 = vector.broadcast %6 : vector<2x8x1xf32> to vector<2x8x32xf32>
    %8 = arith.subf %3, %7 : vector<2x8x32xf32>
    %9 = math.exp %8 : vector<2x8x32xf32>
    %cst_6 = arith.constant dense<0.000000e+00> : vector<2x8xf32>
    %10 = vector.multi_reduction <add>, %9, %cst_6 [2] : vector<2x8x32xf32> to vector<2x8xf32>
    %11 = vector.shape_cast %10 : vector<2x8xf32> to vector<2x8x1xf32>
    %12 = math.log %11 : vector<2x8x1xf32>
    %13 = arith.addf %6, %12 : vector<2x8x1xf32>
    %14 = tpu.iota {dimensions = array<i32: 2>} : vector<2x8x32xi32>
    %15 = vector.broadcast %4 : vector<2x8x1xi32> to vector<2x8x32xi32>
    %16 = arith.cmpi eq, %14, %15 : vector<2x8x32xi32>
    %cst_7 = arith.constant 0.000000e+00 : f32
    %17 = vector.broadcast %cst_7 : f32 to vector<2x8x32xf32>
    %18 = arith.select %16, %3, %17 : vector<2x8x32xi1>, vector<2x8x32xf32>
    %cst_8 = arith.constant dense<0.000000e+00> : vector<2x8xf32>
    %19 = vector.multi_reduction <add>, %18, %cst_8 [2] : vector<2x8x32xf32> to vector<2x8xf32>
    %20 = vector.shape_cast %19 : vector<2x8xf32> to vector<2x8x1xf32>
    %21 = arith.subf %13, %20 : vector<2x8x1xf32>
    %cst_9 = arith.constant dense<0.000000e+00> : vector<8x1xf32>
    %22 = vector.multi_reduction <add>, %21, %cst_9 [0] : vector<2x8x1xf32> to vector<8x1xf32>
    %c1_i32 = arith.constant 1 : i32
    %23 = arith.muli %arg0, %c1_i32 : i32
    %24 = arith.addi %23, %arg1 : i32
    %c8_i32 = arith.constant 8 : i32
    %25 = arith.muli %24, %c8_i32 : i32
    %26 = tpu.iota {dimensions = array<i32: 0>} : vector<8x1xi32>
    %27 = vector.broadcast %25 : i32 to vector<8x1xi32>
    %28 = arith.addi %27, %26 : vector<8x1xi32>
    %c8_i32_10 = arith.constant 8 : i32
    %29 = vector.broadcast %c8_i32_10 : i32 to vector<8x1xi32>
    %30 = arith.cmpi slt, %28, %29 : vector<8x1xi32>
    %c0_11 = arith.constant 0 : index
    %c0_12 = arith.constant 0 : index
    %c0_13 = arith.constant 0 : index
    %31 = vector.load %arg4[%c0_11, %c0_12, %c0_13] : memref<1x1x1xf32, #tpu.memory_space<vmem>>, vector<1x1x1xf32>
    %cst_14 = arith.constant 0.000000e+00 : f32
    %32 = vector.broadcast %cst_14 : f32 to vector<8x1xf32>
    %33 = arith.select %30, %22, %32 : vector<8x1xi1>, vector<8x1xf32>
    %34 = vector.shape_cast %33 : vector<8x1xf32> to vector<1x8x1xf32>
    %cst_15 = arith.constant dense<0.000000e+00> : vector<1xf32>
    %35 = vector.multi_reduction <add>, %34, %cst_15 [1, 2] : vector<1x8x1xf32> to vector<1xf32>
    %36 = vector.shape_cast %35 : vector<1xf32> to vector<1x1x1xf32>
    %37 = vector.extract %36[0, 0, 0] : f32 from vector<1x1x1xf32>
    %38 = vector.broadcast %37 : f32 to vector<1x1x1xf32>
    %39 = arith.addf %31, %38 : vector<1x1x1xf32>
    %c0_16 = arith.constant 0 : index
    %c0_17 = arith.constant 0 : index
    %c0_18 = arith.constant 0 : index
    %40 = vector.load %arg4[%c0_16, %c0_17, %c0_18] : memref<1x1x1xf32, #tpu.memory_space<vmem>>, vector<1x1x1xf32>
    tpu.vector_store %arg4[%c0_16, %c0_17, %c0_18], %39 {strides = array<i32>} : memref<1x1x1xf32, #tpu.memory_space<vmem>>, vector<1x1x1xf32>,
    return
  }
  func.func @transform_0(%arg0: i32, %arg1: i32) -> (i32, i32, i32) {
    %c1_i32 = arith.constant 1 : i32
    %0 = arith.muli %arg0, %c1_i32 : i32
    %1 = arith.addi %0, %arg1 : i32
    %c0_i32 = arith.constant 0 : i32
    %2 = arith.minsi %1, %c0_i32 : i32
    %c0_i32_0 = arith.constant 0 : i32
    %c0_i32_1 = arith.constant 0 : i32
    %c0_i32_2 = arith.constant 0 : i32
    return %c0_i32_0, %2, %c0_i32_1 : i32, i32, i32
  }
  func.func @transform_1(%arg0: i32, %arg1: i32) -> (i32, i32, i32) {
    %c1_i32 = arith.constant 1 : i32
    %0 = arith.muli %arg0, %c1_i32 : i32
    %1 = arith.addi %0, %arg1 : i32
    %c0_i32 = arith.constant 0 : i32
    %2 = arith.minsi %1, %c0_i32 : i32
    %c0_i32_0 = arith.constant 0 : i32
    %c0_i32_1 = arith.constant 0 : i32
    %c0_i32_2 = arith.constant 0 : i32
    return %c0_i32_0, %2, %c0_i32_1 : i32, i32, i32
  }
  func.func @transform_2(%arg0: i32, %arg1: i32) -> (i32, i32, i32) {
    %c0_i32 = arith.constant 0 : i32
    %c0_i32_0 = arith.constant 0 : i32
    %c0_i32_1 = arith.constant 0 : i32
    return %arg0, %c0_i32, %c0_i32_0 : i32, i32, i32
  }
}

</mosaic_0001>

<bundles_post_ra>
// kernel: tpu_custom_call.1
= control target key start
LH: loop header
LB: loop body
LE: loop exit
PB: predicated region body
PF: predicated region fallthrough
CT: control target
= control target key end

     0   :  { %vm76_vm0 = vcmask 261120   ;;  %v211_v4 = vmov 0   ;;  %s261_s0 = inlined_call_operand.vmem [shape: f32[2,8,32], index: 0, kind: input, shape index: {}]   ;;  %s262_s1 = inlined_call_operand.vmem [shape: s32[2,8,1], index: 1, kind: input, shape index: {}]   ;;  %s263_s2 = inlined_call_operand.hbm [shape: f32[1,1,1], index: 2, kind: output, shape index: {}]  }
   0x1   :  { %v72_v0 = vld [vmem:[%s261_s0] sm:$0xff]  ;;  %v73_v1 = vld [vmem:[%s261_s0 + $0x8] sm:$0xff]  ;;  %177 = vset.pattern.permute.xlu1 %v211_v4  ;;  %178 = vset.pattern.permute.xlu0 %v211_v4 }
   0x2   :  { %v74_v2 = vld [vmem:[%s262_s1] sm:$0xff]  ;;  %v77_v3 = vsel %vm76_vm0, %v72_v0, -inf }
   0x3   :  { %7 = vsyncpa [#allocation3], 0  ;;  %78 = vmax.xlane.f32.xlu0 %v77_v3  ;;  %104 = vperm.xlu1 %177, %v74_v2   ;;  %v80_v5 = vsel %vm76_vm0, %v73_v1, -inf  ;;  %v75_v6 = vld [vmem:[%s262_s1 + $0x8] sm:$0xff]  ;;  %v101_v11 = vlaneseq  ;;  %vm131_vm3 = vcmask 7168   ;;  %vm70_vm4 = vcmask 0  }
   0x4   :  { %v212_v39 = vmov 0.0   ;;  %s213_s0 = smov [#allocation2]  }
   0x5   :  { %v102_v15 = vand.u32 127, %v101_v11  ;;  %71 = vst.msk [vmem:[#allocation2] sm:$0x1] %vm70_vm4, %v212_v39  ;;  %s152_s1 = sshll.u32 %s213_s0, 4  ;;  %s153_s1 = int_to_ptr.vmem [resolvable:$true] %s152_s1 }
   0x6   :  { %s187_s18 = scalar_lea.vmem %s153_s1, 16  ;;  %s191_s19 = scalar_lea.vmem %s153_s1, 32 }
   0x7   :  { %81 = vmax.xlane.f32.xlu0 %v80_v5  ;;  %107 = vperm.xlu1 %177, %v75_v6   ;;  %p188_p0 = scmp.ne.s32.totalorder %s153_s1, %s187_s18  ;;  %p192_p1 = scmp.lt.s32.totalorder %s153_s1, %s153_s1 }
   0x8   :  { %p193_p2 = scmp.lt.s32.totalorder %s191_s19, %s187_s18 }
   0xa   :  { %p194_p3 = por %p193_p2, %p192_p1 }
   0xc   :  { %v129_v47 = vld [vmem:[#allocation2] sm:$0x1]  ;;  %p195_p4 = pnand %p194_p3, %p188_p0 }
  0x82   :  { %v105_v14 = vpop.permute.xlu1 %104 }
  0x83   :  { %vm109_vm1 = vcmp.eq.s32.totalorder %v102_v15, %v105_v14 }
  0x84   :  { %v111_v18 = vsel %vm109_vm1, %v72_v0, 0.0 }
  0x85   :  { %v113_v20 = vsel %vm76_vm0, %v111_v18, 0.0 }
  0x86   :  { %v108_v16 = vpop.permute.xlu1 %107 }
  0x87   :  { %vm110_vm2 = vcmp.eq.s32.totalorder %v102_v15, %v108_v16 }
  0x88   :  { %v112_v22 = vsel %vm110_vm2, %v73_v1, 0.0 }
  0x89   :  { %v116_v24 = vsel %vm76_vm0, %v112_v22, 0.0 }
  0x90   :  { %v79_v7 = vpop.xlane.xlu0 %78 }
  0x91   :  { %v83_v8 = vsub.f32 %v72_v0, %v79_v7 }
  0x93   :  { %v85_v9 = vmul.f32 1.442695, %v83_v8 }
  0x94   :  { %v82_v10 = vpop.xlane.xlu0 %81 }
  0x95   :  { %179 = vpow2.f32 %v85_v9  ;;  %v84_v12 = vsub.f32 %v73_v1, %v82_v10 }
  0x97   :  { %v87_v13 = vmul.f32 1.442695, %v84_v12 }
  0x99   :  { %181 = vpow2.f32 %v87_v13 }
  0x9f   :  { %v180_v17 = vpop.eup %179 }
  0xa0   :  { %v89_v19 = vsel %vm76_vm0, %v180_v17, 0.0 }
  0xa1   :  { %90 = vadd.xlane.f32.xlu0 %v89_v19 }
  0xa3   :  { %v182_v21 = vpop.eup %181 }
  0xa4   :  { %v92_v23 = vsel %vm76_vm0, %v182_v21, 0.0 }
  0xa5   :  { %93 = vadd.xlane.f32.xlu1 %v92_v23  ;;  %114 = vadd.xlane.f32.xlu0 %v113_v20 }
  0xa9   :  { %117 = vadd.xlane.f32.xlu0 %v116_v24 }
 0x12e   :  { %v91_v25 = vpop.xlane.xlu0 %90 }
 0x12f   :  { %183 = vlog2.f32 %v91_v25 }
 0x132   :  { %v94_v26 = vpop.xlane.xlu1 %93  ;;  %v115_v29 = vpop.xlane.xlu0 %114 }
 0x133   :  { %185 = vlog2.f32 %v94_v26 }
 0x136   :  { %v118_v34 = vpop.xlane.xlu0 %117 }
 0x139   :  { %v184_v27 = vpop.eup %183 }
 0x13a   :  { %v96_v28 = vmul.f32 0.6931472, %v184_v27 }
 0x13c   :  { %v99_v32 = vadd.f32 %v96_v28, %v79_v7 }
 0x13d   :  { %v186_v30 = vpop.eup %185 }
 0x13e   :  { %v98_v31 = vmul.f32 0.6931472, %v186_v30  ;;  %v119_v35 = vsub.f32 %v99_v32, %v115_v29 }
 0x140   :  { %v100_v33 = vadd.f32 %v98_v31, %v82_v10 }
 0x142   :  { %v120_v36 = vsub.f32 %v100_v33, %v118_v34 }
 0x144   :  { %v121_v37 = vadd.f32 %v120_v36, %v119_v35 }
 0x146   :  { %v132_v38 = vsel %vm131_vm3, %v121_v37, 0.0 }
 0x147   :  { %133 = vadd.xlane.f32.xlu0 %v132_v38 }
 0x1d4   :  { %v134_v40 = vpop.xlane.xlu0 %133 }
 0x1d5   :  { %v135_v41 = vrot.slane %v134_v40, 4 }
 0x1d7   :  { %v136_v42 = vadd.f32 %v135_v41, %v134_v40 }
 0x1d9   :  { %v137_v43 = vrot.slane %v136_v42, 2 }
 0x1db   :  { %v138_v44 = vadd.f32 %v137_v43, %v136_v42 }
 0x1dd   :  { %v139_v45 = vrot.slane %v138_v44, 1 }
 0x1df   :  { %v140_v46 = vadd.f32 %v139_v45, %v138_v44 }
 0x1e1   :  { %172 = vpush %v140_v46 }
 0x212   :  { %s173_s17 = spop %172 }
 0x213   :  { %v142_v48 = vstv %s173_s17 }
 0x214   :  { %v143_v49 = vadd.f32 %v142_v48, %v129_v47 }
 0x216   :  { %145 = vst.msk [vmem:[#allocation2] sm:$0x1] %vm70_vm4, %v143_v49 }
 0x217   :  { %198 = shalt.err (!%p195_p4)
}
 0x218   :  { %s199_s22 = scalar_lea.hbm %s263_s2, 16 }
 0x219   :  { %p200_p5 = scmp.ne.s32.totalorder %s263_s2, %s199_s22  ;;  %p203_p6 = scmp.lt.u32.totalorder %s199_s22, %s263_s2 }
 0x21b   :  { %p205_p7 = pnand %p203_p6, %p200_p5 }
 0x21d   :  { %208 = shalt.err (!%p205_p7)
}
 0x21e   :  { %155 = dma.vmem_to_hbm [thread:$0]  %s153_s1, 16, %s263_s2, [#allocation3]  }
 0x21f   :  { %209 = dma.done.wait [#allocation3], 16  }
 0x220   :  { %210 = vsyncadd [#allocation3], 4294967280 }
 0x221   :  { %159 = vsyncpa [#allocation3], 1 }

</bundles_post_ra>
